<compile_context>
chip_gen: v7x
topology: tpu7x:2x2x1
jax: 0.10.0
libtpu: 0.0.40
codegen_flags: <defaults>
</compile_context>

<pallas_src>
import functools

import jax
import jax.numpy as jnp
import numpy as np
from jax import lax
from jax.experimental import pallas as pl
from jax.experimental.pallas import tpu as pltpu


def _rup(x, m):
    return -(-x // m) * m


# ----------------------------------------------------------------------------- kernel

def attn_decoder_kernel(ids_ref, hid0_ref, enc_ref, slab_ref, out_ref, hid_sc,
                        *, H, V, S, B, offs, col_offs):
    """One decode step per grid iteration.

    ids:  (B, 1) int32 VMEM (per-step block of a (T,B,1) array)
    hid0: (2, B, H) initial hidden (resident; only read at t==0)
    enc:  (B, S, 2H) encoder outputs (resident)
    slab: packed f32 weight slab (resident)
    out:  (B, out_w) packed per-step output block
    hid_sc: (2, B, H) VMEM scratch carrying the hidden state across steps
    """
    t = pl.program_id(0)

    @pl.when(t == 0)
    def _init():
        hid_sc[...] = hid0_ref[...]

    h0 = hid_sc[0]                                       # (B, H)
    h1 = hid_sc[1]                                       # (B, H)
    qcat = jnp.concatenate([h0, h1], axis=-1)            # (B, 2H)
    enc = enc_ref[...]                                   # (B, S, 2H)

    def w(name, rows, cols):
        o = offs[name]
        return slab_ref[o:o + rows, 0:cols]

    # ---- Attention_II ('general'): softmax((q W_attn) . enc^T) over source positions
    qp = jnp.dot(qcat, w('attn', 2 * H, 2 * H),
                 preferred_element_type=jnp.float32)     # (B, 2H)
    scores = jnp.sum(qp[:, None, :] * enc, axis=-1)      # (B, S)  VPU bcast + XLU reduce
    m = jnp.max(scores, axis=-1, keepdims=True)
    e = jnp.exp(scores - m)
    attnw = e / jnp.sum(e, axis=-1, keepdims=True)       # exact divide (tiny (B,1) denom)
    ctx = jnp.sum(attnw[:, :, None] * enc, axis=1)       # (B, 2H)

    # ---- embedding gather as one-hot: one vectorized compare (padding_idx row is 0)
    col_iota = lax.broadcasted_iota(jnp.int32, (B, V), 1)
    onehot = (col_iota == ids_ref[...]).astype(jnp.float32)   # (B, V)

    # ---- attn_combine(cat(embedded, attn_applied)) + ReLU
    #      embedding lookup + the 'embedded' half of the combine are folded into the
    #      packed weight block:  [onehot | ctx] @ [E @ Wce ; Wcc]  (single matmul)
    xcomb = jnp.concatenate([onehot, ctx], axis=-1)       # (B, V + 2H)
    pre = (jnp.dot(xcomb, w('comb', V + 2 * H, H),
                   preferred_element_type=jnp.float32)
           + w('b_comb', 1, H))
    c = jnp.maximum(pre, 0.0)                             # (B, H)

    # ---- bidirectional GRU, seq_len == 1; shared input-gate matmul, two hh dots
    gx = (jnp.dot(c, w('ih', H, 6 * H), preferred_element_type=jnp.float32)
          + w('b_ih', 1, 6 * H))                          # (B, 6H)
    gh0 = (jnp.dot(h0, w('hh_f', H, 3 * H), preferred_element_type=jnp.float32)
           + w('b_hh_f', 1, 3 * H))                       # (B, 3H)
    gh1 = (jnp.dot(h1, w('hh_b', H, 3 * H), preferred_element_type=jnp.float32)
           + w('b_hh_b', 1, 3 * H))                       # (B, 3H)

    def gru_gates(gx3, gh3, h):
        r = jax.nn.sigmoid(gx3[:, 0:H] + gh3[:, 0:H])
        z = jax.nn.sigmoid(gx3[:, H:2 * H] + gh3[:, H:2 * H])
        n = jnp.tanh(gx3[:, 2 * H:3 * H] + r * gh3[:, 2 * H:3 * H])
        return (1.0 - z) * n + z * h

    hn0 = gru_gates(gx[:, 0:3 * H], gh0, h0)
    hn1 = gru_gates(gx[:, 3 * H:6 * H], gh1, h1)

    # carry hidden to the next decode step
    hid_sc[0] = hn0
    hid_sc[1] = hn1

    # ---- out Linear on cat(h_fwd, h_bwd) + log_softmax
    hcat = jnp.concatenate([hn0, hn1], axis=-1)           # (B, 2H)
    logits = (jnp.dot(hcat, w('out', 2 * H, V), preferred_element_type=jnp.float32)
              + w('b_out', 1, V))                          # (B, V)
    shifted = logits - jnp.max(logits, axis=-1, keepdims=True)
    logp = shifted - jnp.log(jnp.sum(jnp.exp(shifted), axis=-1, keepdims=True))

    # ---- direct sliced stores at 128-aligned column offsets (no lane concat)
    o_logp, o_h0, o_h1, o_attn = col_offs
    out_ref[:, o_logp:o_logp + V] = logp
    out_ref[:, o_h0:o_h0 + H] = hn0
    out_ref[:, o_h1:o_h1 + H] = hn1
    out_ref[:, o_attn:o_attn + S] = attnw


# ----------------------------------------------------------------------------- one-time weight packing (hoisted out of the per-sequence path)

def prepare_params(params):
    H = int(params['hidden_size'])
    V = int(params['output_size'])
    f32 = np.float32

    Wd = _rup(max(6 * H, 3 * H, 2 * H, V), 128)           # lane-dense slab width

    emb = np.asarray(params['embedding'], f32)             # (V, H), row 0 == 0
    w_attn_t = np.asarray(params['w_attn'], f32).T         # (2H, 2H)
    wcomb_t = np.asarray(params['w_combine'], f32).T       # (3H, H)
    # fold embedding lookup into the combine matmul:  onehot @ (E @ Wce)
    w_comb_cat = np.concatenate([emb @ wcomb_t[:H], wcomb_t[H:]], axis=0)   # (V+2H, H)

    w_ih_cat = np.concatenate([np.asarray(params['w_ih_f'], f32).T,
                               np.asarray(params['w_ih_b'], f32).T], axis=1)  # (H, 6H)
    w_hh_f = np.asarray(params['w_hh_f'], f32).T            # (H, 3H)
    w_hh_b = np.asarray(params['w_hh_b'], f32).T            # (H, 3H)
    w_out_t = np.asarray(params['w_out'], f32).T             # (2H, V)

    b_c = np.asarray(params['b_combine'], f32)[None, :]                      # (1, H)
    b_ih = np.concatenate([np.asarray(params['b_ih_f'], f32),
                           np.asarray(params['b_ih_b'], f32)])[None, :]      # (1, 6H)
    b_hh_f = np.asarray(params['b_hh_f'], f32)[None, :]                      # (1, 3H)
    b_hh_b = np.asarray(params['b_hh_b'], f32)[None, :]                      # (1, 3H)
    b_out = np.asarray(params['b_out'], f32)[None, :]                        # (1, V)

    blocks = [('attn', w_attn_t), ('comb', w_comb_cat), ('ih', w_ih_cat),
              ('hh_f', w_hh_f), ('hh_b', w_hh_b), ('out', w_out_t),
              ('b_comb', b_c), ('b_ih', b_ih), ('b_hh_f', b_hh_f),
              ('b_hh_b', b_hh_b), ('b_out', b_out)]

    offs, chunks, cur = {}, [], 0
    for name, wgt in blocks:                                # each block on a sublane tile
        offs[name] = cur
        r, ccols = wgt.shape
        rp = _rup(r, 8)
        padded = np.zeros((rp, Wd), f32)
        padded[:r, :ccols] = wgt
        chunks.append(padded)
        cur += rp

    slab = jnp.asarray(np.concatenate(chunks, axis=0))       # single packed weight slab
    return dict(H=H, V=V, Wd=Wd, offs=offs, slab=slab)


# ----------------------------------------------------------------------------- forward builder

def make_forward(prep, B, S, T):
    """Multi-step (teacher-forced) decoder: T sequential applications of the module's
    forward, weights/encoder-outputs resident in VMEM, hidden carried in scratch."""
    H, V = prep['H'], prep['V']
    Wd = prep['Wd']
    slab_rows = prep['slab'].shape[0]

    o_logp = 0
    o_h0 = _rup(V, 128)
    o_h1 = o_h0 + _rup(H, 128)
    o_attn = o_h1 + _rup(H, 128)
    out_w = o_attn + _rup(S, 128)

    kern = functools.partial(attn_decoder_kernel, H=H, V=V, S=S, B=B,
                             offs=prep['offs'],
                             col_offs=(o_logp, o_h0, o_h1, o_attn))

    grid_spec = pltpu.PrefetchScalarGridSpec(
        num_scalar_prefetch=0,
        grid=(T,),
        in_specs=[
            pl.BlockSpec((None, B, 1), lambda t: (t, 0, 0)),        # token ids (per step)
            pl.BlockSpec((2, B, H), lambda t: (0, 0, 0)),           # initial hidden (resident)
            pl.BlockSpec((B, S, 2 * H), lambda t: (0, 0, 0)),       # encoder outputs (resident)
            pl.BlockSpec((slab_rows, Wd), lambda t: (0, 0)),        # weight slab (resident)
        ],
        out_specs=pl.BlockSpec((None, B, out_w), lambda t: (t, 0, 0)),
        scratch_shapes=[pltpu.VMEM((2, B, H), jnp.float32)],        # carried hidden state
    )

    call = pl.pallas_call(
        kern,
        out_shape=jax.ShapeDtypeStruct((T, B, out_w), jnp.float32),
        grid_spec=grid_spec,
        compiler_params=pltpu.CompilerParams(
            dimension_semantics=("arbitrary",)),                    # steps are sequential
    )

    def forward(slab, token_ids_TB, hidden, encoder_outputs):
        ids3 = token_ids_TB.astype(jnp.int32).reshape(T, B, 1)
        packed = call(ids3, hidden, encoder_outputs, slab)          # (T, B, out_w)
        logp = packed[:, :, o_logp:o_logp + V]                      # (T, B, V)
        hn0 = packed[:, :, o_h0:o_h0 + H]                           # (T, B, H)
        hn1 = packed[:, :, o_h1:o_h1 + H]                           # (T, B, H)
        attnw = packed[:, :, o_attn:o_attn + S]                     # (T, B, S)
        hidden_all = jnp.stack([hn0, hn1], axis=1)                  # (T, 2, B, H)
        return logp, hidden_all, attnw

    return forward


# ----------------------------------------------------------------------------- reference (pure JAX)

def reference_forward(params, token_ids, hidden, encoder_outputs):
    H = params['hidden_size']
    emb = params['embedding'][token_ids]                              # (B, H)
    B = emb.shape[0]
    qcat = jnp.transpose(hidden, (1, 0, 2)).reshape(B, 2 * H)
    qp = qcat @ params['w_attn'].T
    scores = jnp.einsum('bh,bsh->bs', qp, encoder_outputs)
    w = jax.nn.softmax(scores, axis=-1)
    ctx = jnp.einsum('bs,bsh->bh', w, encoder_outputs)
    comb = jnp.concatenate([emb, ctx], axis=-1)
    c = jax.nn.relu(comb @ params['w_combine'].T + params['b_combine'])

    def cell(x, h, wih, whh, bih, bhh):
        gx = x @ wih.T + bih
        gh = h @ whh.T + bhh
        r = jax.nn.sigmoid(gx[:, :H] + gh[:, :H])
        z = jax.nn.sigmoid(gx[:, H:2 * H] + gh[:, H:2 * H])
        n = jnp.tanh(gx[:, 2 * H:] + r * gh[:, 2 * H:])
        return (1.0 - z) * n + z * h

    hn0 = cell(c, hidden[0], params['w_ih_f'], params['w_hh_f'],
               params['b_ih_f'], params['b_hh_f'])
    hn1 = cell(c, hidden[1], params['w_ih_b'], params['w_hh_b'],
               params['b_ih_b'], params['b_hh_b'])
    gout = jnp.concatenate([hn0, hn1], axis=-1)
    logits = gout @ params['w_out'].T + params['b_out']
    logp = jax.nn.log_softmax(logits, axis=-1)
    return logp[:, None, :], jnp.stack([hn0, hn1], axis=0), w[:, None, :]


def reference_multistep(params, ids_TB, hidden, encoder_outputs):
    logps, attns = [], []
    h = hidden
    for t in range(ids_TB.shape[0]):
        o, h, w = reference_forward(params, ids_TB[t], h, encoder_outputs)
        logps.append(o[:, 0, :])
        attns.append(w[:, 0, :])
    return jnp.stack(logps), h, jnp.stack(attns)


# ----------------------------------------------------------------------------- params

def init_params(key, hidden_size, output_size):
    H, V = hidden_size, output_size
    ks = jax.random.split(key, 14)

    def uni(k, shape, fan_in):
        bound = 1.0 / np.sqrt(fan_in)
        return jax.random.uniform(k, shape, jnp.float32, -bound, bound)

    emb = jax.random.normal(ks[0], (V, H), jnp.float32)
    emb = emb.at[0].set(0.0)  # padding_idx=0

    return dict(
        hidden_size=H, output_size=V,
        embedding=emb,
        w_attn=uni(ks[1], (2 * H, 2 * H), 2 * H),
        w_combine=uni(ks[2], (H, 3 * H), 3 * H),
        b_combine=uni(ks[3], (H,), 3 * H),
        w_ih_f=uni(ks[4], (3 * H, H), H), w_hh_f=uni(ks[5], (3 * H, H), H),
        b_ih_f=uni(ks[6], (3 * H,), H),  b_hh_f=uni(ks[7], (3 * H,), H),
        w_ih_b=uni(ks[8], (3 * H, H), H), w_hh_b=uni(ks[9], (3 * H, H), H),
        b_ih_b=uni(ks[10], (3 * H,), H), b_hh_b=uni(ks[11], (3 * H,), H),
        w_out=uni(ks[12], (V, 2 * H), 2 * H),
        b_out=uni(ks[13], (V,), 2 * H),
    )


# ----------------------------------------------------------------------------- main

if __name__ == "__main__":
    B, H, V, S, T = 2, 32, 40, 8, 5

    key = jax.random.PRNGKey(0)
    kp, kh, ke, ki = jax.random.split(key, 4)

    params = init_params(kp, H, V)

    token_ids = jax.random.randint(ki, (T, B), 1, V).astype(jnp.int32)
    token_ids = token_ids.at[0, 1].set(0)                            # exercise padding_idx
    hidden = 0.1 * jax.random.normal(kh, (2, B, H), jnp.float32)     # (num_dirs, B, H)
    encoder_outputs = jax.random.normal(ke, (B, S, 2 * H), jnp.float32)

    prep = prepare_params(params)                 # one-time host-side weight packing

    # ---- single step (T=1): exact module-forward semantics
    fwd1 = jax.jit(make_forward(prep, B, S, 1))
    logp1, hid1, attn1 = fwd1(prep['slab'], token_ids[:1], hidden, encoder_outputs)
    jax.block_until_ready((logp1, hid1, attn1))

    ref_out, ref_hidden, ref_w = reference_forward(params, token_ids[0], hidden,
                                                   encoder_outputs)
    assert logp1.shape == (1, B, V) and hid1.shape == (1, 2, B, H) and attn1.shape == (1, B, S)
    np.testing.assert_allclose(np.asarray(logp1[0]), np.asarray(ref_out[:, 0, :]),
                               rtol=1e-3, atol=1e-3)
    np.testing.assert_allclose(np.asarray(hid1[0]), np.asarray(ref_hidden),
                               rtol=1e-3, atol=1e-3)
    np.testing.assert_allclose(np.asarray(attn1[0]), np.asarray(ref_w[:, 0, :]),
                               rtol=1e-3, atol=1e-3)

    # ---- T teacher-forced steps in ONE kernel launch (resident weights, carried hidden)
    fwdT = jax.jit(make_forward(prep, B, S, T))
    logpT, hidT, attnT = fwdT(prep['slab'], token_ids, hidden, encoder_outputs)
    jax.block_until_ready((logpT, hidT, attnT))

    ref_logpT, ref_hid_final, ref_attnT = reference_multistep(params, token_ids, hidden,
                                                              encoder_outputs)
    np.testing.assert_allclose(np.asarray(logpT), np.asarray(ref_logpT),
                               rtol=1e-3, atol=1e-3)
    np.testing.assert_allclose(np.asarray(hidT[-1]), np.asarray(ref_hid_final),
                               rtol=1e-3, atol=1e-3)
    np.testing.assert_allclose(np.asarray(attnT), np.asarray(ref_attnT),
                               rtol=1e-3, atol=1e-3)

    print("KERNEL_OK")
</pallas_src>

<mosaic_0001>
module attributes {stable_mosaic.version = 11 : i64} {
  func.func @attn_decoder_kernel(%arg0: i32, %arg1: memref<1x2x1xi32, #tpu.memory_space<vmem>>, %arg2: memref<2x2x32xf32, #tpu.memory_space<vmem>>, %arg3: memref<2x8x64xf32, #tpu.memory_space<vmem>>, %arg4: memref<368x256xf32, #tpu.memory_space<vmem>>, %arg5: memref<1x2x512xf32, #tpu.memory_space<vmem>>, %arg6: memref<2x2x32xf32, #tpu.memory_space<vmem>>) attributes {dimension_semantics = [#tpu.dimension_semantics<arbitrary>], iteration_bounds = array<i64: 1>, scalar_prefetch = 0 : i64, scratch_operands = 1 : i64, tpu.core_type = #tpu.core_type<tc>, window_params = [{transform_indices = @transform_0, window_bounds = array<i64: 1, 2, 1>}, {pipeline_mode = #tpu.pipeline_mode<synchronous>, transform_indices = @transform_1, window_bounds = array<i64: 2, 2, 32>}, {pipeline_mode = #tpu.pipeline_mode<synchronous>, transform_indices = @transform_2, window_bounds = array<i64: 2, 8, 64>}, {pipeline_mode = #tpu.pipeline_mode<synchronous>, transform_indices = @transform_3, window_bounds = array<i64: 368, 256>}, {transform_indices = @transform_4, window_bounds = array<i64: 1, 2, 512>}]} {
    %c0_i32 = arith.constant 0 : i32
    %0 = arith.cmpi eq, %arg0, %c0_i32 : i32
    %1 = arith.extui %0 : i1 to i32
    %c0_i32_0 = arith.constant 0 : i32
    %2 = arith.cmpi ne, %1, %c0_i32_0 : i32
    scf.if %2 {
      %c0_56 = arith.constant 0 : index
      %c0_57 = arith.constant 0 : index
      %c0_58 = arith.constant 0 : index
      %146 = vector.load %arg2[%c0_56, %c0_57, %c0_58] : memref<2x2x32xf32, #tpu.memory_space<vmem>>, vector<2x2x32xf32>
      %c0_59 = arith.constant 0 : index
      %c0_60 = arith.constant 0 : index
      %c0_61 = arith.constant 0 : index
      %147 = vector.load %arg6[%c0_59, %c0_60, %c0_61] : memref<2x2x32xf32, #tpu.memory_space<vmem>>, vector<2x2x32xf32>
      tpu.vector_store %arg6[%c0_59, %c0_60, %c0_61], %146 {strides = array<i32>} : memref<2x2x32xf32, #tpu.memory_space<vmem>>, vector<2x2x32xf32>,
    } else {
    }
    %c0 = arith.constant 0 : index
    %c0_1 = arith.constant 0 : index
    %c0_2 = arith.constant 0 : index
    %3 = vector.load %arg6[%c0, %c0_1, %c0_2] : memref<2x2x32xf32, #tpu.memory_space<vmem>>, vector<1x2x32xf32>
    %4 = vector.shape_cast %3 : vector<1x2x32xf32> to vector<2x32xf32>
    %c1 = arith.constant 1 : index
    %c0_3 = arith.constant 0 : index
    %c0_4 = arith.constant 0 : index
    %5 = vector.load %arg6[%c1, %c0_3, %c0_4] : memref<2x2x32xf32, #tpu.memory_space<vmem>>, vector<1x2x32xf32>
    %6 = vector.shape_cast %5 : vector<1x2x32xf32> to vector<2x32xf32>
    %7 = tpu.concatenate %4, %6 in 1 : vector<2x32xf32>, vector<2x32xf32> -> vector<2x64xf32>
    %c0_5 = arith.constant 0 : index
    %c0_6 = arith.constant 0 : index
    %c0_7 = arith.constant 0 : index
    %8 = vector.load %arg3[%c0_5, %c0_6, %c0_7] : memref<2x8x64xf32, #tpu.memory_space<vmem>>, vector<2x8x64xf32>
    %c0_8 = arith.constant 0 : index
    %c0_9 = arith.constant 0 : index
    %9 = vector.load %arg4[%c0_8, %c0_9] : memref<368x256xf32, #tpu.memory_space<vmem>>, vector<64x64xf32>
    %cst = arith.constant dense<0.000000e+00> : vector<2x64xf32>
    %10 = tpu.matmul %7, %9, %cst {dimension_numbers = #tpu.dot_dimension_numbers<[1], [0], [0], [1], [0, 0, 1, 1], [], []>} : vector<2x64xf32>, vector<64x64xf32>, vector<2x64xf32> -> vector<2x64xf32>
    %11 = vector.shape_cast %10 : vector<2x64xf32> to vector<2x1x64xf32>
    %12 = vector.broadcast %11 : vector<2x1x64xf32> to vector<2x8x64xf32>
    %13 = arith.mulf %12, %8 : vector<2x8x64xf32>
    %cst_10 = arith.constant dense<0.000000e+00> : vector<2x8xf32>
    %14 = vector.multi_reduction <add>, %13, %cst_10 [2] : vector<2x8x64xf32> to vector<2x8xf32>
    %cst_11 = arith.constant dense<0xFF800000> : vector<2xf32>
    %15 = vector.multi_reduction <maximumf>, %14, %cst_11 [1] : vector<2x8xf32> to vector<2xf32>
    %16 = vector.shape_cast %15 : vector<2xf32> to vector<2x1xf32>
    %17 = vector.broadcast %16 : vector<2x1xf32> to vector<2x8xf32>
    %18 = arith.subf %14, %17 : vector<2x8xf32>
    %19 = math.exp %18 : vector<2x8xf32>
    %cst_12 = arith.constant dense<0.000000e+00> : vector<2xf32>
    %20 = vector.multi_reduction <add>, %19, %cst_12 [1] : vector<2x8xf32> to vector<2xf32>
    %21 = vector.shape_cast %20 : vector<2xf32> to vector<2x1xf32>
    %22 = vector.broadcast %21 : vector<2x1xf32> to vector<2x8xf32>
    %23 = arith.divf %19, %22 : vector<2x8xf32>
    %24 = vector.shape_cast %23 : vector<2x8xf32> to vector<2x8x1xf32>
    %25 = vector.broadcast %24 : vector<2x8x1xf32> to vector<2x8x64xf32>
    %26 = arith.mulf %25, %8 : vector<2x8x64xf32>
    %cst_13 = arith.constant dense<0.000000e+00> : vector<2x64xf32>
    %27 = vector.multi_reduction <add>, %26, %cst_13 [1] : vector<2x8x64xf32> to vector<2x64xf32>
    %28 = tpu.iota {dimensions = array<i32: 1>} : vector<2x40xi32>
    %c0_14 = arith.constant 0 : index
    %c0_15 = arith.constant 0 : index
    %c0_16 = arith.constant 0 : index
    %29 = vector.load %arg1[%c0_14, %c0_15, %c0_16] : memref<1x2x1xi32, #tpu.memory_space<vmem>>, vector<1x2x1xi32>
    %30 = vector.shape_cast %29 : vector<1x2x1xi32> to vector<2x1xi32>
    %31 = vector.broadcast %30 : vector<2x1xi32> to vector<2x40xi32>
    %32 = arith.cmpi eq, %28, %31 : vector<2x40xi32>
    %33 = arith.extui %32 : vector<2x40xi1> to vector<2x40xi32>
    %34 = arith.sitofp %33 : vector<2x40xi32> to vector<2x40xf32>
    %35 = tpu.concatenate %34, %27 in 1 : vector<2x40xf32>, vector<2x64xf32> -> vector<2x104xf32>
    %c64 = arith.constant 64 : index
    %c0_17 = arith.constant 0 : index
    %36 = vector.load %arg4[%c64, %c0_17] : memref<368x256xf32, #tpu.memory_space<vmem>>, vector<104x32xf32>
    %cst_18 = arith.constant dense<0.000000e+00> : vector<2x32xf32>
    %37 = tpu.matmul %35, %36, %cst_18 {dimension_numbers = #tpu.dot_dimension_numbers<[1], [0], [0], [1], [0, 0, 1, 1], [], []>} : vector<2x104xf32>, vector<104x32xf32>, vector<2x32xf32> -> vector<2x32xf32>
    %c328 = arith.constant 328 : index
    %c0_19 = arith.constant 0 : index
    %38 = vector.load %arg4[%c328, %c0_19] : memref<368x256xf32, #tpu.memory_space<vmem>>, vector<1x32xf32>
    %39 = vector.broadcast %38 : vector<1x32xf32> to vector<2x32xf32>
    %40 = arith.addf %37, %39 : vector<2x32xf32>
    %cst_20 = arith.constant 0.000000e+00 : f32
    %41 = vector.broadcast %cst_20 : f32 to vector<2x32xf32>
    %42 = arith.maximumf %40, %41 : vector<2x32xf32>
    %c168 = arith.constant 168 : index
    %c0_21 = arith.constant 0 : index
    %43 = vector.load %arg4[%c168, %c0_21] : memref<368x256xf32, #tpu.memory_space<vmem>>, vector<32x192xf32>
    %cst_22 = arith.constant dense<0.000000e+00> : vector<2x192xf32>
    %44 = tpu.matmul %42, %43, %cst_22 {dimension_numbers = #tpu.dot_dimension_numbers<[1], [0], [0], [1], [0, 0, 1, 1], [], []>} : vector<2x32xf32>, vector<32x192xf32>, vector<2x192xf32> -> vector<2x192xf32>
    %c336 = arith.constant 336 : index
    %c0_23 = arith.constant 0 : index
    %45 = vector.load %arg4[%c336, %c0_23] : memref<368x256xf32, #tpu.memory_space<vmem>>, vector<1x192xf32>
    %46 = vector.broadcast %45 : vector<1x192xf32> to vector<2x192xf32>
    %47 = arith.addf %44, %46 : vector<2x192xf32>
    %c200 = arith.constant 200 : index
    %c0_24 = arith.constant 0 : index
    %48 = vector.load %arg4[%c200, %c0_24] : memref<368x256xf32, #tpu.memory_space<vmem>>, vector<32x96xf32>
    %cst_25 = arith.constant dense<0.000000e+00> : vector<2x96xf32>
    %49 = tpu.matmul %4, %48, %cst_25 {dimension_numbers = #tpu.dot_dimension_numbers<[1], [0], [0], [1], [0, 0, 1, 1], [], []>} : vector<2x32xf32>, vector<32x96xf32>, vector<2x96xf32> -> vector<2x96xf32>
    %c344 = arith.constant 344 : index
    %c0_26 = arith.constant 0 : index
    %50 = vector.load %arg4[%c344, %c0_26] : memref<368x256xf32, #tpu.memory_space<vmem>>, vector<1x96xf32>
    %51 = vector.broadcast %50 : vector<1x96xf32> to vector<2x96xf32>
    %52 = arith.addf %49, %51 : vector<2x96xf32>
    %c232 = arith.constant 232 : index
    %c0_27 = arith.constant 0 : index
    %53 = vector.load %arg4[%c232, %c0_27] : memref<368x256xf32, #tpu.memory_space<vmem>>, vector<32x96xf32>
    %cst_28 = arith.constant dense<0.000000e+00> : vector<2x96xf32>
    %54 = tpu.matmul %6, %53, %cst_28 {dimension_numbers = #tpu.dot_dimension_numbers<[1], [0], [0], [1], [0, 0, 1, 1], [], []>} : vector<2x32xf32>, vector<32x96xf32>, vector<2x96xf32> -> vector<2x96xf32>
    %c352 = arith.constant 352 : index
    %c0_29 = arith.constant 0 : index
    %55 = vector.load %arg4[%c352, %c0_29] : memref<368x256xf32, #tpu.memory_space<vmem>>, vector<1x96xf32>
    %56 = vector.broadcast %55 : vector<1x96xf32> to vector<2x96xf32>
    %57 = arith.addf %54, %56 : vector<2x96xf32>
    %58 = vector.extract_strided_slice %47 {offsets = [0, 0], sizes = [2, 96], strides = [1, 1]} : vector<2x192xf32> to vector<2x96xf32>
    %59 = vector.extract_strided_slice %58 {offsets = [0, 0], sizes = [2, 32], strides = [1, 1]} : vector<2x96xf32> to vector<2x32xf32>
    %60 = vector.extract_strided_slice %52 {offsets = [0, 0], sizes = [2, 32], strides = [1, 1]} : vector<2x96xf32> to vector<2x32xf32>
    %61 = arith.addf %59, %60 : vector<2x32xf32>
    %62 = arith.negf %61 : vector<2x32xf32>
    %63 = math.exp %62 : vector<2x32xf32>
    %cst_30 = arith.constant 1.000000e+00 : f32
    %64 = vector.broadcast %cst_30 : f32 to vector<2x32xf32>
    %65 = arith.addf %64, %63 : vector<2x32xf32>
    %66 = arith.divf %64, %65 : vector<2x32xf32>
    %67 = vector.extract_strided_slice %58 {offsets = [0, 32], sizes = [2, 32], strides = [1, 1]} : vector<2x96xf32> to vector<2x32xf32>
    %68 = vector.extract_strided_slice %52 {offsets = [0, 32], sizes = [2, 32], strides = [1, 1]} : vector<2x96xf32> to vector<2x32xf32>
    %69 = arith.addf %67, %68 : vector<2x32xf32>
    %70 = arith.negf %69 : vector<2x32xf32>
    %71 = math.exp %70 : vector<2x32xf32>
    %cst_31 = arith.constant 1.000000e+00 : f32
    %72 = vector.broadcast %cst_31 : f32 to vector<2x32xf32>
    %73 = arith.addf %72, %71 : vector<2x32xf32>
    %74 = arith.divf %72, %73 : vector<2x32xf32>
    %75 = vector.extract_strided_slice %58 {offsets = [0, 64], sizes = [2, 32], strides = [1, 1]} : vector<2x96xf32> to vector<2x32xf32>
    %76 = vector.extract_strided_slice %52 {offsets = [0, 64], sizes = [2, 32], strides = [1, 1]} : vector<2x96xf32> to vector<2x32xf32>
    %77 = arith.mulf %66, %76 : vector<2x32xf32>
    %78 = arith.addf %75, %77 : vector<2x32xf32>
    %79 = math.tanh %78 : vector<2x32xf32>
    %cst_32 = arith.constant 1.000000e+00 : f32
    %80 = vector.broadcast %cst_32 : f32 to vector<2x32xf32>
    %81 = arith.subf %80, %74 : vector<2x32xf32>
    %82 = arith.mulf %81, %79 : vector<2x32xf32>
    %83 = arith.mulf %74, %4 : vector<2x32xf32>
    %84 = arith.addf %82, %83 : vector<2x32xf32>
    %85 = vector.extract_strided_slice %47 {offsets = [0, 96], sizes = [2, 96], strides = [1, 1]} : vector<2x192xf32> to vector<2x96xf32>
    %86 = vector.extract_strided_slice %85 {offsets = [0, 0], sizes = [2, 32], strides = [1, 1]} : vector<2x96xf32> to vector<2x32xf32>
    %87 = vector.extract_strided_slice %57 {offsets = [0, 0], sizes = [2, 32], strides = [1, 1]} : vector<2x96xf32> to vector<2x32xf32>
    %88 = arith.addf %86, %87 : vector<2x32xf32>
    %89 = arith.negf %88 : vector<2x32xf32>
    %90 = math.exp %89 : vector<2x32xf32>
    %cst_33 = arith.constant 1.000000e+00 : f32
    %91 = vector.broadcast %cst_33 : f32 to vector<2x32xf32>
    %92 = arith.addf %91, %90 : vector<2x32xf32>
    %93 = arith.divf %91, %92 : vector<2x32xf32>
    %94 = vector.extract_strided_slice %85 {offsets = [0, 32], sizes = [2, 32], strides = [1, 1]} : vector<2x96xf32> to vector<2x32xf32>
    %95 = vector.extract_strided_slice %57 {offsets = [0, 32], sizes = [2, 32], strides = [1, 1]} : vector<2x96xf32> to vector<2x32xf32>
    %96 = arith.addf %94, %95 : vector<2x32xf32>
    %97 = arith.negf %96 : vector<2x32xf32>
    %98 = math.exp %97 : vector<2x32xf32>
    %cst_34 = arith.constant 1.000000e+00 : f32
    %99 = vector.broadcast %cst_34 : f32 to vector<2x32xf32>
    %100 = arith.addf %99, %98 : vector<2x32xf32>
    %101 = arith.divf %99, %100 : vector<2x32xf32>
    %102 = vector.extract_strided_slice %85 {offsets = [0, 64], sizes = [2, 32], strides = [1, 1]} : vector<2x96xf32> to vector<2x32xf32>
    %103 = vector.extract_strided_slice %57 {offsets = [0, 64], sizes = [2, 32], strides = [1, 1]} : vector<2x96xf32> to vector<2x32xf32>
    %104 = arith.mulf %93, %103 : vector<2x32xf32>
    %105 = arith.addf %102, %104 : vector<2x32xf32>
    %106 = math.tanh %105 : vector<2x32xf32>
    %cst_35 = arith.constant 1.000000e+00 : f32
    %107 = vector.broadcast %cst_35 : f32 to vector<2x32xf32>
    %108 = arith.subf %107, %101 : vector<2x32xf32>
    %109 = arith.mulf %108, %106 : vector<2x32xf32>
    %110 = arith.mulf %101, %6 : vector<2x32xf32>
    %111 = arith.addf %109, %110 : vector<2x32xf32>
    %c0_36 = arith.constant 0 : index
    %c0_37 = arith.constant 0 : index
    %c0_38 = arith.constant 0 : index
    %112 = vector.load %arg6[%c0_36, %c0_37, %c0_38] : memref<2x2x32xf32, #tpu.memory_space<vmem>>, vector<1x2x32xf32>
    %113 = vector.shape_cast %112 : vector<1x2x32xf32> to vector<2x32xf32>
    %114 = vector.shape_cast %84 : vector<2x32xf32> to vector<1x2x32xf32>
    tpu.vector_store %arg6[%c0_36, %c0_37, %c0_38], %114 {strides = array<i32>} : memref<2x2x32xf32, #tpu.memory_space<vmem>>, vector<1x2x32xf32>,
    %c1_39 = arith.constant 1 : index
    %c0_40 = arith.constant 0 : index
    %c0_41 = arith.constant 0 : index
    %115 = vector.load %arg6[%c1_39, %c0_40, %c0_41] : memref<2x2x32xf32, #tpu.memory_space<vmem>>, vector<1x2x32xf32>
    %116 = vector.shape_cast %115 : vector<1x2x32xf32> to vector<2x32xf32>
    %117 = vector.shape_cast %111 : vector<2x32xf32> to vector<1x2x32xf32>
    tpu.vector_store %arg6[%c1_39, %c0_40, %c0_41], %117 {strides = array<i32>} : memref<2x2x32xf32, #tpu.memory_space<vmem>>, vector<1x2x32xf32>,
    %118 = tpu.concatenate %84, %111 in 1 : vector<2x32xf32>, vector<2x32xf32> -> vector<2x64xf32>
    %c264 = arith.constant 264 : index
    %c0_42 = arith.constant 0 : index
    %119 = vector.load %arg4[%c264, %c0_42] : memref<368x256xf32, #tpu.memory_space<vmem>>, vector<64x40xf32>
    %cst_43 = arith.constant dense<0.000000e+00> : vector<2x40xf32>
    %120 = tpu.matmul %118, %119, %cst_43 {dimension_numbers = #tpu.dot_dimension_numbers<[1], [0], [0], [1], [0, 0, 1, 1], [], []>} : vector<2x64xf32>, vector<64x40xf32>, vector<2x40xf32> -> vector<2x40xf32>
    %c360 = arith.constant 360 : index
    %c0_44 = arith.constant 0 : index
    %121 = vector.load %arg4[%c360, %c0_44] : memref<368x256xf32, #tpu.memory_space<vmem>>, vector<1x40xf32>
    %122 = vector.broadcast %121 : vector<1x40xf32> to vector<2x40xf32>
    %123 = arith.addf %120, %122 : vector<2x40xf32>
    %cst_45 = arith.constant dense<0xFF800000> : vector<2xf32>
    %124 = vector.multi_reduction <maximumf>, %123, %cst_45 [1] : vector<2x40xf32> to vector<2xf32>
    %125 = vector.shape_cast %124 : vector<2xf32> to vector<2x1xf32>
    %126 = vector.broadcast %125 : vector<2x1xf32> to vector<2x40xf32>
    %127 = arith.subf %123, %126 : vector<2x40xf32>
    %128 = math.exp %127 : vector<2x40xf32>
    %cst_46 = arith.constant dense<0.000000e+00> : vector<2xf32>
    %129 = vector.multi_reduction <add>, %128, %cst_46 [1] : vector<2x40xf32> to vector<2xf32>
    %130 = vector.shape_cast %129 : vector<2xf32> to vector<2x1xf32>
    %131 = math.log %130 : vector<2x1xf32>
    %132 = vector.broadcast %131 : vector<2x1xf32> to vector<2x40xf32>
    %133 = arith.subf %127, %132 : vector<2x40xf32>
    %c0_47 = arith.constant 0 : index
    %c0_48 = arith.constant 0 : index
    %c0_49 = arith.constant 0 : index
    %134 = vector.load %arg5[%c0_47, %c0_48, %c0_49] : memref<1x2x512xf32, #tpu.memory_space<vmem>>, vector<1x2x40xf32>
    %135 = vector.shape_cast %134 : vector<1x2x40xf32> to vector<2x40xf32>
    %136 = vector.shape_cast %133 : vector<2x40xf32> to vector<1x2x40xf32>
    tpu.vector_store %arg5[%c0_47, %c0_48, %c0_49], %136 {strides = array<i32>} : memref<1x2x512xf32, #tpu.memory_space<vmem>>, vector<1x2x40xf32>,
    %c0_50 = arith.constant 0 : index
    %c0_51 = arith.constant 0 : index
    %c128 = arith.constant 128 : index
    %137 = vector.load %arg5[%c0_50, %c0_51, %c128] : memref<1x2x512xf32, #tpu.memory_space<vmem>>, vector<1x2x32xf32>
    %138 = vector.shape_cast %137 : vector<1x2x32xf32> to vector<2x32xf32>
    %139 = vector.shape_cast %84 : vector<2x32xf32> to vector<1x2x32xf32>
    tpu.vector_store %arg5[%c0_50, %c0_51, %c128], %139 {strides = array<i32>} : memref<1x2x512xf32, #tpu.memory_space<vmem>>, vector<1x2x32xf32>,
    %c0_52 = arith.constant 0 : index
    %c0_53 = arith.constant 0 : index
    %c256 = arith.constant 256 : index
    %140 = vector.load %arg5[%c0_52, %c0_53, %c256] : memref<1x2x512xf32, #tpu.memory_space<vmem>>, vector<1x2x32xf32>
    %141 = vector.shape_cast %140 : vector<1x2x32xf32> to vector<2x32xf32>
    %142 = vector.shape_cast %111 : vector<2x32xf32> to vector<1x2x32xf32>
    tpu.vector_store %arg5[%c0_52, %c0_53, %c256], %142 {strides = array<i32>} : memref<1x2x512xf32, #tpu.memory_space<vmem>>, vector<1x2x32xf32>,
    %c0_54 = arith.constant 0 : index
    %c0_55 = arith.constant 0 : index
    %c384 = arith.constant 384 : index
    %143 = vector.load %arg5[%c0_54, %c0_55, %c384] : memref<1x2x512xf32, #tpu.memory_space<vmem>>, vector<1x2x8xf32>
    %144 = vector.shape_cast %143 : vector<1x2x8xf32> to vector<2x8xf32>
    %145 = vector.shape_cast %23 : vector<2x8xf32> to vector<1x2x8xf32>
    tpu.vector_store %arg5[%c0_54, %c0_55, %c384], %145 {strides = array<i32>} : memref<1x2x512xf32, #tpu.memory_space<vmem>>, vector<1x2x8xf32>,
    return
  }
  func.func @transform_0(%arg0: i32) -> (i32, i32, i32) {
    %c0_i32 = arith.constant 0 : i32
    %c0_i32_0 = arith.constant 0 : i32
    %c0_i32_1 = arith.constant 0 : i32
    return %arg0, %c0_i32, %c0_i32_0 : i32, i32, i32
  }
  func.func @transform_1(%arg0: i32) -> (i32, i32, i32) {
    %c0_i32 = arith.constant 0 : i32
    %c0_i32_0 = arith.constant 0 : i32
    %c0_i32_1 = arith.constant 0 : i32
    %c0_i32_2 = arith.constant 0 : i32
    return %c0_i32, %c0_i32_0, %c0_i32_1 : i32, i32, i32
  }
  func.func @transform_2(%arg0: i32) -> (i32, i32, i32) {
    %c0_i32 = arith.constant 0 : i32
    %c0_i32_0 = arith.constant 0 : i32
    %c0_i32_1 = arith.constant 0 : i32
    %c0_i32_2 = arith.constant 0 : i32
    return %c0_i32, %c0_i32_0, %c0_i32_1 : i32, i32, i32
  }
  func.func @transform_3(%arg0: i32) -> (i32, i32) {
    %c0_i32 = arith.constant 0 : i32
    %c0_i32_0 = arith.constant 0 : i32
    %c0_i32_1 = arith.constant 0 : i32
    return %c0_i32, %c0_i32_0 : i32, i32
  }
  func.func @transform_4(%arg0: i32) -> (i32, i32, i32) {
    %c0_i32 = arith.constant 0 : i32
    %c0_i32_0 = arith.constant 0 : i32
    %c0_i32_1 = arith.constant 0 : i32
    return %arg0, %c0_i32, %c0_i32_0 : i32, i32, i32
  }
}

</mosaic_0001>

<bundles_post_ra>
// kernel: forward.1
= control target key start
LH: loop header
LB: loop body
LE: loop exit
PB: predicated region body
PF: predicated region fallthrough
CT: control target
= control target key end

     0   :  { %9 = vsyncpa [#allocation4], 0  ;;  %s1437_s0 = inlined_call_operand.vmem [shape: s32[1,2,1], index: 0, kind: input, shape index: {}]   ;;  %s1438_s1 = inlined_call_operand.vmem [shape: f32[2,2,32], index: 1, kind: input, shape index: {}]   ;;  %s1439_s2 = inlined_call_operand.hbm [shape: f32[2,8,64], index: 2, kind: input, shape index: {}]   ;;  %s1440_s3 = inlined_call_operand.hbm [shape: f32[368,256], index: 3, kind: input, shape index: {}]   ;;  %s1441_s4 = inlined_call_operand.vmem [shape: f32[1,2,512], index: 4, kind: output, shape index: {}]  }
   0x1   :  { %10 = vsyncpa [#allocation6], 0  ;;  %s1220_s15 = smov [#allocation3]   ;;  %s1172_s19 = scalar_lea.hbm %s1439_s2, 256 }
   0x2   :  { %s20_s16 = sshll.u32 %s1220_s15, 4  ;;  %p1173_p0 = scmp.ne.s32.totalorder %s1439_s2, %s1172_s19  ;;  %s21_s16 = int_to_ptr.vmem [resolvable:$true] %s20_s16 }
   0x3   :  { %p1176_p1 = scmp.lt.u32.totalorder %s1172_s19, %s1439_s2 }
   0x5   :  { %p1178_p2 = pnand %p1176_p1, %p1173_p0 }
   0x7   :  { %1181 = shalt.err (!%p1178_p2)
}
   0x8   :  { %s1182_s24 = scalar_lea.vmem %s21_s16, 256  ;;  %p1187_p4 = scmp.lt.s32.totalorder %s21_s16, %s21_s16 }
   0x9   :  { %p1183_p3 = scmp.ne.s32.totalorder %s21_s16, %s1182_s24  ;;  %p1188_p5 = scmp.lt.s32.totalorder %s1182_s24, %s1182_s24 }
   0xb   :  { %p1189_p6 = por %p1188_p5, %p1187_p4 }
   0xd   :  { %p1190_p7 = pnand %p1189_p6, %p1183_p3 }
   0xf   :  { %1193 = shalt.err (!%p1190_p7)
}
  0x10   :  { %s1221_s25 = smov 128   ;;  %s1222_s26 = smov 8  }
  0x11   :  { %26 = dma.hbm_to_vmem [thread:$0]  %s1439_s2, 256, %s21_s16, [#allocation4], %s1221_s25, %s1221_s25, %s1222_s26  }
  0x12   :  { %s1223_s29 = smov [#allocation5]   ;;  %s1194_s7 = scalar_lea.hbm %s1440_s3, 11776 }
  0x13   :  { %s32_s30 = sshll.u32 %s1223_s29, 4  ;;  %p1195_p8 = scmp.ne.s32.totalorder %s1440_s3, %s1194_s7  ;;  %s33_s30 = int_to_ptr.vmem [resolvable:$true] %s32_s30 }
  0x14   :  { %p1198_p9 = scmp.lt.u32.totalorder %s1194_s7, %s1440_s3 }
  0x16   :  { %p1200_p10 = pnand %p1198_p9, %p1195_p8 }
  0x18   :  { %1203 = shalt.err (!%p1200_p10)
}
  0x19   :  { %s1204_s12 = scalar_lea.vmem %s33_s30, 11776  ;;  %p1209_p12 = scmp.lt.s32.totalorder %s33_s30, %s33_s30 }
  0x1a   :  { %p1205_p11 = scmp.ne.s32.totalorder %s33_s30, %s1204_s12  ;;  %p1210_p13 = scmp.lt.s32.totalorder %s1204_s12, %s1204_s12 }
  0x1c   :  { %p1211_p0 = por %p1210_p13, %p1209_p12 }
  0x1e   :  { %p1212_p1 = pnand %p1211_p0, %p1205_p11 }
  0x20   :  { %1215 = shalt.err (!%p1212_p1)
}
  0x21   :  { %s1224_s2 = smov 256   ;;  %s1225_s13 = smov 16  }
  0x22   :  { %38 = dma.hbm_to_vmem [thread:$0]  %s1440_s3, 11776, %s33_s30, [#allocation6], %s1224_s2, %s1224_s2, %s1225_s13  }
  0x23   :  { %1216 = dma.done.wait [#allocation4], 256  }
  0x24   :  { %1217 = vsyncadd [#allocation4], 4294967040 }
  0x25   :  { %1218 = dma.done.wait [#allocation6], 11776  }
  0x26   :  { %1219 = vsyncadd [#allocation6], 4294955520  ;;  %v1226_v0 = vmov 0.0|0.0   ;;  %vm1227_vm0 = vmmov 0   ;;  %v1228_v1 = vmov 0.0   ;;  %vm51_vm1 = vcmask 254976  }
  0x27   :  { %1064 = vmatprep.subr.bf16.mxu0 %v1226_v0  ;;  %1076 = vmatprep.subr.bf16.mxu1 %v1226_v0  ;;  %v50_v2 = vld [vmem:[%s1438_s1 + $0x2] sm:$0x3]  ;;  %v65_v3 = vld [vmem:[#allocation5] sm:$0xff]  ;;  %v66_v4 = vld [vmem:[#allocation5 + $0x10] sm:$0xff]  ;;  %s1229_s19 = smov 32   ;;  %vm61_vm2 = vcmask 261120   ;;  %v151_v22 = vlaneseq }
  0x28   :  { %991 = vmatprep.mubr.msk.f32.mxu0 %vm1227_vm0, %v1228_v1  ;;  %1020 = vmatprep.mubr.msk.f32.mxu1 %vm1227_vm0, %v1228_v1  ;;  %53 = vst.msk [vmem:[#allocation2 + $0x2] sm:$0x3] %vm51_vm1, %v50_v2  ;;  %v1065_v5 = vpack.c.bf16 %v66_v4, %v65_v3  ;;  %v67_v6 = vld [vmem:[#allocation5 + $0x20] sm:$0xff]  ;;  %v68_v7 = vld [vmem:[#allocation5 + $0x30] sm:$0xff]  ;;  %v49_v9 = vld [vmem:[%s1438_s1] sm:$0x3] }
  0x29   :  { %v1068_v8 = vpack.c.bf16 %v68_v7, %v67_v6  ;;  %v69_v10 = vld [vmem:[#allocation5 + $0x40] sm:$0xff]  ;;  %v70_v11 = vld [vmem:[#allocation5 + $0x50] sm:$0xff]  ;;  %52 = vst.msk [vmem:[#allocation2] sm:$0x3] %vm51_vm1, %v49_v9  ;;  %vm73_vm3 = vcmask 523264   ;;  %v1314_v24 = vshrl.u32 %v151_v22, 7 }
  0x2a   :  { %1066 = vmatpush3.bf16.msra.mxu0 %v1065_v5  ;;  %v1071_v12 = vpack.c.bf16 %v70_v11, %v69_v10  ;;  %v71_v14 = vld [vmem:[#allocation5 + $0x60] sm:$0xff]  ;;  %v72_v15 = vld [vmem:[#allocation5 + $0x70] sm:$0xff]  ;;  %v1230_v20 = vmov 1966171168   ;;  %v1323_v35 = vld [vmem:[#allocation3 + $0x8] sm:$0xff]  ;;  %v1330_v41 = vand.u32 127, %v151_v22 }
  0x2b   :  { %1067 = vmatprep.subr.bf16.mxu0 %v1226_v0  ;;  %v1074_v16 = vpack.c.bf16 %v72_v15, %v71_v14  ;;  %v149_v21 = vunpack.c.l.s4 %v1230_v20  ;;  %v1318_v29 = vsub.s32 0, %v1314_v24  ;;  %v1320_v32 = vld [vmem:[#allocation3] sm:$0xff]  ;;  %vm200_vm4 = vcmask 1041409   ;;  %v286_v11 = vld [vmem:[%s1437_s0] sm:$0x3]  ;;  %v303_v15 = vld [vmem:[#allocation5 + $0xa0] sm:$0xff] }
  0x2c   :  { %v1334_v42 = vsub.s32 %v1330_v41, %v1314_v24  ;;  %vm203_vm5 = vcmask 58368   ;;  %v1231_v49 = vmov 0   ;;  %v1341_v50 = vsub.s32 1, %v1314_v24  ;;  %v302_v14 = vld [vmem:[#allocation5 + $0x90] sm:$0xff]  ;;  %v305_v20 = vld [vmem:[#allocation5 + $0xc0] sm:$0xff]  ;;  %s1232_s0 = smov 40  }
  0x2d   :  { %v150_v23 = vunpack.c.0.s8 %v149_v21  ;;  %1142 = vset.pattern.permute.xlu1 %v1231_v49  ;;  %1143 = vset.pattern.permute.xlu0 %v1231_v49  ;;  %v306_v21 = vld [vmem:[#allocation5 + $0xd0] sm:$0xff]  ;;  %v486_v49 = vld [vmem:[#allocation5 + $0x1a0] sm:$0xff]  ;;  %vm299_vm7 = vcmask 326656   ;;  %vm315_vm8 = vcmask 850944   ;;  %s1233_s21 = smov 64   ;;  %s1234_s22 = smov 96  }
  0x2e   :  { %1069 = vmatpush3.bf16.msra.mxu0 %v1068_v8  ;;  %v1083_v22 = vpack.c.bf16 %v306_v21, %v305_v20  ;;  %vm799_vm9 = vcmask 320512  }
  0x2f   :  { %v1300_v13 = vld [vmem:[#allocation2 + $0x2] sm:$0x3]  ;;  %1070 = vmatprep.subr.bf16.mxu0 %v1226_v0  ;;  %v153_v25 = vsub.s32 %v150_v23, %v1314_v24  ;;  %v307_v23 = vld [vmem:[#allocation5 + $0xe0] sm:$0xff] }
  0x30   :  { %58 = vrot.lane.b32.xlu0 %v1300_v13, %s1229_s19  ;;  %v1307_v17 = vld [vmem:[#allocation2] sm:$0x3] }
  0x32   :  { %1072 = vmatpush3.bf16.msra.mxu0 %v1071_v12  ;;  %v301_v12 = vld [vmem:[#allocation5 + $0x80] sm:$0xff] }
  0x33   :  { %1073 = vmatprep.subr.bf16.mxu0 %v1226_v0 }
  0x36   :  { %1075 = vmatpush3.bf16.msra.mxu0 %v1074_v16  ;;  %v1077_v16 = vpack.c.bf16 %v302_v14, %v301_v12  ;;  %v395_v14 = vld [vmem:[#allocation5 + $0x178] sm:$0xff] }
  0x37   :  { %1102 = vmatprep.subr.bf16.mxu0 %v1226_v0 }
  0x38   :  { %1078 = vmatpush3.bf16.msra.mxu1 %v1077_v16 }
  0x39   :  { %1079 = vmatprep.subr.bf16.mxu1 %v1226_v0 }
  0xa2   :  { %v59_v18 = vpop.permute.xlu0 %58 }
  0xa3   :  { %v62_v19 = vsel %vm61_vm2, %v1307_v17, %v59_v18  ;;  %v304_v18 = vld [vmem:[#allocation5 + $0xb0] sm:$0xff] }
  0xa4   :  { %992 = vmatmul.mubr.msk.f32.vlgmr.msra.gmra.mrb[0].mxu0 %vm73_vm3, %v62_v19  ;;  %v1080_v19 = vpack.c.bf16 %v304_v18, %v303_v15  ;;  %v397_v15 = vld [vmem:[#allocation5 + $0x188] sm:$0xff]  ;;  %v394_v18 = vld [vmem:[#allocation5 + $0x170] sm:$0xff] }
  0xa5   :  { %1031 = vmatprep.mubr.msk.f32.mxu0 %vm1227_vm0, %v1228_v1  ;;  %v1098_v16 = vpack.c.bf16 %v397_v15, %v395_v14  ;;  %v718_v14 = vld [vmem:[#allocation5 + $0x220] sm:$0xff]  ;;  %v719_v15 = vld [vmem:[#allocation5 + $0x230] sm:$0xff] }
  0xa6   :  { %1081 = vmatpush3.bf16.msra.mxu1 %v1080_v19  ;;  %v396_v19 = vld [vmem:[#allocation5 + $0x180] sm:$0xff] }
  0xa7   :  { %1082 = vmatprep.subr.bf16.mxu1 %v1226_v0  ;;  %v1100_v20 = vpack.c.bf16 %v396_v19, %v394_v18 }
  0xaa   :  { %1084 = vmatpush3.bf16.msra.mxu1 %v1083_v22 }
  0xab   :  { %1085 = vmatprep.subr.bf16.mxu1 %v1226_v0 }
 0x177   :  { %v143_v26 = vpop.f32.mrb[0].mxu0 }
 0x178   :  { %v154_v27 = vrot.slane %v143_v26, %v153_v25  ;;  %v993_v28 = vpop.f32.mrb[1].mxu0 }
 0x179   :  { %v310_v28 = vld [vmem:[#allocation5 + $0x110] sm:$0xff] }
 0x17a   :  { %v155_v30 = vcombine.high %v154_v27, %v154_v27  ;;  %v162_v31 = vrot.slane %v154_v27, %v153_v25  ;;  %v309_v27 = vld [vmem:[#allocation5 + $0x100] sm:$0xff] }
 0x17c   :  { %v169_v33 = vrot.slane %v155_v30, %v153_v25  ;;  %v173_v34 = vrot.slane %v162_v31, %v1318_v29  ;;  %v308_v25 = vld [vmem:[#allocation5 + $0xf0] sm:$0xff]  ;;  %v1089_v30 = vpack.c.bf16 %v310_v28, %v309_v27  ;;  %v311_v31 = vld [vmem:[#allocation5 + $0x120] sm:$0xff] }
 0x17d   :  { %v1086_v26 = vpack.c.bf16 %v308_v25, %v307_v23  ;;  %v314_v25 = vld [vmem:[#allocation5 + $0x290] ss:$0 sm:$0xff]  ;;  %v564_v27 = vld [vmem:[#allocation5 + $0x1e0] sm:$0xff] }
 0x17e   :  { %v180_v36 = vmul.f32 %v173_v34, %v1320_v32  ;;  %v177_v37 = vrot.slane %v169_v33, %v1318_v29  ;;  %v312_v33 = vld [vmem:[#allocation5 + $0x130] sm:$0xff] }
 0x17f   :  { %1087 = vmatpush3.bf16.msra.mxu1 %v1086_v26  ;;  %v1092_v34 = vpack.c.bf16 %v312_v33, %v311_v31  ;;  %v563_v26 = vld [vmem:[#allocation5 + $0x1d0] sm:$0xff] }
 0x180   :  { %v182_v38 = vsel %vm73_vm3, %v180_v36, 0.0  ;;  %v181_v39 = vmul.f32 %v177_v37, %v1323_v35  ;;  %1088 = vmatprep.subr.bf16.mxu1 %v1226_v0  ;;  %v1109_v33 = vpack.c.bf16 %v564_v27, %v563_v26  ;;  %v724_v26 = vld [vmem:[#allocation5 + $0x280] sm:$0xff] }
 0x181   :  { %183 = vadd.xlane.f32.xlu0 %v182_v38 }
 0x182   :  { %v185_v40 = vsel %vm73_vm3, %v181_v39, 0.0 }
 0x183   :  { %186 = vadd.xlane.f32.xlu1 %v185_v40  ;;  %1090 = vmatpush3.bf16.msra.mxu1 %v1089_v30 }
 0x184   :  { %1091 = vmatprep.subr.bf16.mxu1 %v1226_v0 }
 0x187   :  { %1093 = vmatpush3.bf16.msra.mxu1 %v1092_v34 }
 0x188   :  { %1018 = vmatprep.subr.mxu1 %v1228_v1 }
 0x20e   :  { %v184_v43 = vpop.xlane.xlu0 %183 }
 0x20f   :  { %v195_v45 = vrot.slane %v184_v43, %v1334_v42 }
 0x210   :  { %v187_v44 = vpop.xlane.xlu1 %186 }
 0x211   :  { %v199_v46 = vrot.slane %v187_v44, %v1334_v42 }
 0x213   :  { %v201_v47 = vsel %vm200_vm4, %v199_v46, %v195_v45  ;;  %v313_v45 = vld [vmem:[#allocation5 + $0x140] sm:$0xff] }
 0x214   :  { %v204_v48 = vsel %vm203_vm5, %v201_v47, -inf  ;;  %1019 = vmatpush3.msra.mxu1 %v313_v45 }
 0x215   :  { %205 = vmax.xlane.f32.xlu1 %v204_v48  ;;  %v485_v48 = vld [vmem:[#allocation5 + $0x190] sm:$0xff] }
 0x2a2   :  { %v206_v51 = vpop.xlane.xlu1 %205 }
 0x2a3   :  { %v211_v52 = vrot.slane %v206_v51, %v1318_v29  ;;  %v215_v53 = vrot.slane %v206_v51, %v1341_v50  ;;  %v487_v51 = vld [vmem:[#allocation5 + $0x1b0] sm:$0xff] }
 0x2a5   :  { %v218_v54 = vsub.f32 %v184_v43, %v211_v52  ;;  %v219_v55 = vsub.f32 %v187_v44, %v215_v53  ;;  %v1103_v53 = vpack.c.bf16 %v486_v49, %v485_v48  ;;  %v567_v48 = vld [vmem:[#allocation5 + $0x2c0] ss:$0 sm:$0xff] }
 0x2a7   :  { %v220_v56 = vmul.f32 1.442695, %v218_v54  ;;  %v222_v57 = vmul.f32 1.442695, %v219_v55  ;;  %v488_v54 = vld [vmem:[#allocation5 + $0x1c0] sm:$0xff]  ;;  %v391_v55 = vld [vmem:[#allocation5 + $0x158] sm:$0xff]  ;;  %1104 = vmatpush3.bf16.msra.mxu0 %v1103_v53 }
 0x2a8   :  { %1105 = vmatprep.subr.bf16.mxu0 %v1226_v0 }
 0x2a9   :  { %1144 = vpow2.f32 %v220_v56  ;;  %v393_v56 = vld [vmem:[#allocation5 + $0x168] sm:$0xff] }
 0x2aa   :  { %1146 = vpow2.f32 %v222_v57  ;;  %v1094_v57 = vpack.c.bf16 %v393_v56, %v391_v55 }
 0x2ac   :  { %1095 = vmatprep.subr.bf16.mxu1 %v1094_v57 }
 0x2b3   :  { %v1145_v58 = vpop.eup %1144 }
 0x2b4   :  { %227 = vperm.xlu1 %1142, %v1145_v58   ;;  %v1147_v59 = vpop.eup %1146 }
 0x2b8   :  { %230 = vperm.xlu1 %1142, %v1147_v59  }
 0x333   :  { %v228_v60 = vpop.permute.xlu1 %227 }
 0x334   :  { %v235_v62 = vrot.slane %v228_v60, %v1334_v42 }
 0x337   :  { %v231_v61 = vpop.permute.xlu1 %230 }
 0x338   :  { %v239_v63 = vrot.slane %v231_v61, %v1334_v42 }
 0x33a   :  { %v240_v2 = vsel %vm200_vm4, %v239_v63, %v235_v62 }
 0x33b   :  { %v242_v3 = vsel %vm203_vm5, %v240_v2, 0.0 }
 0x33c   :  { %243 = vadd.xlane.f32.xlu1 %v242_v3 }
 0x3c9   :  { %v244_v4 = vpop.xlane.xlu1 %243 }
 0x3ca   :  { %v249_v5 = vrot.slane %v244_v4, %v1318_v29  ;;  %v253_v6 = vrot.slane %v244_v4, %v1341_v50 }
 0x3cc   :  { %1148 = vrcp.f32 %v249_v5  ;;  %v390_v5 = vld [vmem:[#allocation5 + $0x150] sm:$0xff] }
 0x3cd   :  { %1150 = vrcp.f32 %v253_v6  ;;  %v392_v6 = vld [vmem:[#allocation5 + $0x160] sm:$0xff] }
 0x3d6   :  { %v1149_v7 = vpop.eup %1148 }
 0x3d7   :  { %v1151_v8 = vpop.eup %1150  ;;  %v1351_v9 = vmul.f32 %v1149_v7, %v1145_v58  ;;  %v1106_v58 = vpack.c.bf16 %v488_v54, %v487_v51  ;;  %v1096_v7 = vpack.c.bf16 %v392_v6, %v390_v5 }
 0x3d8   :  { %v1353_v10 = vmul.f32 %v1151_v8, %v1147_v59 }
 0x3d9   :  { %262 = vperm.xlu0 %1143, %v1351_v9   ;;  %1107 = vmatpush3.bf16.msra.mxu0 %v1106_v58 }
 0x3da   :  { %267 = vperm.xlu1 %1142, %v1353_v10   ;;  %1114 = vmatprep.subr.bf16.mxu0 %v1226_v0 }
 0x3dc   :  { %1032 = vmatmul.mubr.msk.f32.vlgmr.msra.gmra.mrb[2].mxu0 %vm61_vm2, %v1307_v17 }
 0x3dd   :  { %288 = vperm.xlu0 %1143, %v286_v11   ;;  %1061 = vmatprep.mubr.msk.f32.mxu0 %vm1227_vm0, %v1228_v1 }
 0x458   :  { %v263_v36 = vpop.permute.xlu0 %262 }
 0x459   :  { %v268_v37 = vpop.permute.xlu1 %267  ;;  %v270_v38 = vmul.f32 %v263_v36, %v1320_v32  ;;  %v565_v36 = vld [vmem:[#allocation5 + $0x1f0] sm:$0xff] }
 0x45a   :  { %v271_v39 = vmul.f32 %v268_v37, %v1323_v35  ;;  %v566_v37 = vld [vmem:[#allocation5 + $0x200] sm:$0xff] }
 0x45b   :  { %v272_v40 = vsel %vm73_vm3, %v270_v38, 0.0  ;;  %v1112_v38 = vpack.c.bf16 %v566_v37, %v565_v36 }
 0x45c   :  { %v279_v43 = vsel %vm73_vm3, %v271_v39, 0.0  ;;  %v273_v44 = vrot.slane %v272_v40, 4  ;;  %v289_v4 = vpop.permute.xlu0 %288  ;;  %v399_v39 = vld [vmem:[#allocation5 + $0x2a0] ss:$8 sm:$0x3] }
 0x45d   :  { %v280_v46 = vrot.slane %v279_v43, 4  ;;  %vm290_vm6 = vcmp.eq.s32.totalorder %v1330_v41, %v289_v4  ;;  %v489_v41 = vld [vmem:[#allocation5 + $0x2b0] ss:$0 sm:$0xff] }
 0x45e   :  { %v274_v47 = vadd.f32 %v273_v44, %v272_v40  ;;  %v924_v8 = vsel %vm290_vm6, 1.0, %v1228_v1  ;;  %v404_v40 = vrot.slane %v399_v39, %v1318_v29 }
 0x45f   :  { %v281_v52 = vadd.f32 %v280_v46, %v279_v43 }
 0x460   :  { %v275_v32 = vrot.slane %v274_v47, 2 }
 0x461   :  { %v282_v35 = vrot.slane %v281_v52, 2 }
 0x462   :  { %v276_v59 = vadd.f32 %v275_v32, %v274_v47 }
 0x463   :  { %v283_v60 = vadd.f32 %v282_v35, %v281_v52 }
 0x464   :  { %v277_v61 = vrot.slane %v276_v59, 1 }
 0x465   :  { %v284_v62 = vrot.slane %v283_v60, 1 }
 0x466   :  { %v278_v63 = vadd.f32 %v277_v61, %v276_v59 }
 0x467   :  { %v285_v2 = vadd.f32 %v284_v62, %v283_v60 }
 0x469   :  { %v295_v3 = vsel %vm200_vm4, %v285_v2, %v278_v63 }
 0x46a   :  { %296 = vrot.lane.b32.xlu1 %v295_v3, %s1232_s0  ;;  %v408_v3 = vrot.slane %v399_v39, %v1341_v50  ;;  %v721_v50 = vld [vmem:[#allocation5 + $0x250] sm:$0xff] }
 0x4af   :  { %v559_v21 = vpop.f32.mrb[2].mxu0 }
 0x4b0   :  { %v560_v22 = vadd.f32 %v559_v21, %v489_v41  ;;  %v1033_v23 = vpop.f32.mrb[3].mxu0  ;;  %v722_v21 = vld [vmem:[#allocation5 + $0x260] sm:$0xff] }
 0x4b2   :  { %648 = vrot.lane.b32.xlu1 %v560_v22, %s1233_s21 }
 0x4dc   :  { %v297_v11 = vpop.permute.xlu1 %296 }
 0x4dd   :  { %v300_v12 = vsel %vm299_vm7, %v924_v8, %v297_v11 }
 0x4de   :  { %1021 = vmatmul.mubr.msk.f32.vlgmr.msra.gmra.mrb[0].mxu1 %vm315_vm8, %v300_v12  ;;  %v717_v12 = vld [vmem:[#allocation5 + $0x210] sm:$0xff] }
 0x4df   :  { %1097 = vmatpush1.bf16.msra.mxu1 %v1096_v7  ;;  %478 = vmatprep.mubr.f32.mxu1 %v1228_v1  ;;  %v1115_v19 = vpack.c.bf16 %v718_v14, %v717_v12 }
 0x4e0   :  { %1099 = vmatprep.subr.bf16.mxu1 %v1098_v16 }
 0x4e1   :  { %1116 = vmatpush3.bf16.msra.mxu0 %v1115_v19 }
 0x4e2   :  { %1117 = vmatprep.subr.bf16.mxu0 %v1226_v0 }
 0x4e3   :  { %1101 = vmatpush1.bf16.msra.mxu1 %v1100_v20  ;;  %v720_v20 = vld [vmem:[#allocation5 + $0x240] sm:$0xff] }
 0x4e4   :  { %1108 = vmatprep.subr.bf16.mxu1 %v1226_v0 }
 0x524   :  { %v649_v54 = vpop.permute.xlu1 %648 }
 0x5b1   :  { %v385_v28 = vpop.f32.mrb[0].mxu1 }
 0x5b2   :  { %v386_v30 = vadd.f32 %v385_v28, %v314_v25  ;;  %v1022_v31 = vpop.f32.mrb[1].mxu1  ;;  %v723_v25 = vld [vmem:[#allocation5 + $0x270] sm:$0xff] }
 0x5b3   :  { %v1124_v27 = vpack.c.bf16 %v724_v26, %v723_v25 }
 0x5b4   :  { %v389_v34 = vmax.f32 %v386_v30, 0.0 }
 0x5b6   :  { %926 = vmatmul.mubr.msk.f32.vlgmr.msra.gmra.mrb[2].mxu1 %vm61_vm2, %v389_v34 }
 0x5b7   :  { %1110 = vmatpush3.bf16.msra.mxu1 %v1109_v33  ;;  %1042 = vmatprep.mubr.msk.f32.mxu1 %vm1227_vm0, %v1228_v1 }
 0x5b8   :  { %1111 = vmatprep.subr.bf16.mxu1 %v1226_v0 }
 0x5bb   :  { %1113 = vmatpush3.bf16.msra.mxu1 %v1112_v38 }
 0x5be   :  { %1043 = vmatmul.mubr.msk.f32.vlgmr.msra.gmra.mrb[4].mxu1 %vm61_vm2, %v1300_v13 }
 0x689   :  { %v480_v43 = vpop.f32.mrb[2].mxu1 }
 0x68a   :  { %v481_v44 = vadd.f32 %v480_v43, %v404_v40  ;;  %v482_v45 = vpop.f32.mrb[3].mxu1 }
 0x68b   :  { %v483_v4 = vadd.f32 %v482_v45, %v408_v3  ;;  %v1235_v45 = vmov 1983009808  }
 0x68c   :  { %v640_v46 = vadd.f32 %v560_v22, %v481_v44  ;;  %v1121_v22 = vpack.c.bf16 %v722_v21, %v721_v50 }
 0x68e   :  { %v929_v47 = vmul.f32 -1.442695, %v640_v46  ;;  %v814_v46 = vunpack.c.l.s4 %v1235_v45 }
 0x690   :  { %1152 = vpow2.f32 %v929_v47  ;;  %v725_v47 = vld [vmem:[#allocation5 + $0x2d0] ss:$0 sm:$0xff] }
 0x691   :  { %v636_v49 = vpop.f32.mrb[4].mxu1 }
 0x692   :  { %v637_v51 = vadd.f32 %v636_v49, %v567_v48  ;;  %v1044_v52 = vpop.f32.mrb[5].mxu1 }
 0x694   :  { %670 = vrot.lane.b32.xlu0 %v637_v51, %s1234_s22 }
 0x698   :  { %687 = vrot.lane.b32.xlu0 %v637_v51, %s1229_s19  ;;  %v815_v51 = vunpack.c.0.s8 %v814_v46 }
 0x69a   :  { %v1153_v1 = vpop.eup %1152 }
 0x69b   :  { %v644_v53 = vadd.f32 1.0, %v1153_v1  ;;  %v825_v1 = vcombine.high %v1351_v9, %v1351_v9 }
 0x69d   :  { %1154 = vrcp.f32 %v644_v53  ;;  %v818_v53 = vsub.s32 %v815_v51, %v1314_v24  ;;  %v842_v24 = vcombine.high %v1353_v10, %v1353_v10 }
 0x6a7   :  { %v1155_v29 = vpop.eup %1154 }
 0x6a8   :  { %v651_v55 = vmul.f32 %v1155_v29, %v649_v54  ;;  %v658_v8 = vsub.f32 1.0, %v1155_v29  ;;  %v839_v54 = vrot.slane %v825_v1, %v818_v53 }
 0x6aa   :  { %653 = vrot.lane.b32.xlu1 %v651_v55, %s1233_s21  ;;  %v841_v55 = vcombine.high %v839_v54, %v839_v54 }
 0x706   :  { %v671_v56 = vpop.permute.xlu0 %670 }
 0x707   :  { %v673_v32 = vadd.f32 %v671_v56, %v481_v44  ;;  %v680_v28 = vadd.f32 %v671_v56, %v483_v4 }
 0x709   :  { %v930_v57 = vmul.f32 -1.442695, %v673_v32  ;;  %v931_v30 = vmul.f32 -1.442695, %v680_v28  ;;  %v860_v32 = vcombine.low %v839_v54, %v841_v55 }
 0x70a   :  { %v688_v62 = vpop.permute.xlu0 %687 }
 0x70b   :  { %1156 = vpow2.f32 %v930_v57 }
 0x715   :  { %v1157_v35 = vpop.eup %1156 }
 0x716   :  { %v677_v58 = vadd.f32 1.0, %v1157_v35  ;;  %v874_v35 = vrot.slane %v860_v32, %v818_v53 }
 0x718   :  { %1158 = vrcp.f32 %v677_v58 }
 0x71c   :  { %v654_v59 = vpop.permute.xlu1 %653 }
 0x71d   :  { %v656_v60 = vadd.f32 %v654_v59, %v481_v44 }
 0x71f   :  { %1160 = vtanh.f32 %v656_v60 }
 0x722   :  { %v1159_v61 = vpop.eup %1158 }
 0x723   :  { %v690_v63 = vmul.f32 %v1159_v61, %v688_v62 }
 0x725   :  { %692 = vrot.lane.b32.xlu0 %v690_v63, %s1233_s21 }
 0x729   :  { %v1161_v2 = vpop.eup %1160  ;;  %664 = vrot.lane.b32.xlu0 %v1307_v17, %s1229_s19  ;;  %v1118_v17 = vpack.c.bf16 %v720_v20, %v719_v15 }
 0x72a   :  { %660 = vrot.lane.b32.xlu1 %v1161_v2, %s1234_s22 }
 0x72b   :  { %1119 = vmatpush3.bf16.msra.mxu0 %v1118_v17 }
 0x72c   :  { %1120 = vmatprep.subr.bf16.mxu0 %v1226_v0 }
 0x72f   :  { %1122 = vmatpush3.bf16.msra.mxu0 %v1121_v22 }
 0x730   :  { %1123 = vmatprep.subr.bf16.mxu0 %v1226_v0 }
 0x733   :  { %1125 = vmatpush3.bf16.msra.mxu0 %v1124_v27 }
 0x797   :  { %v693_v5 = vpop.permute.xlu0 %692 }
 0x798   :  { %v695_v6 = vadd.f32 %v693_v5, %v483_v4  ;;  %v856_v5 = vrot.slane %v842_v24, %v818_v53 }
 0x79a   :  { %1162 = vtanh.f32 %v695_v6  ;;  %v849_v6 = vrot.slane %v1353_v10, %v818_v53 }
 0x79b   :  { %v665_v7 = vpop.permute.xlu0 %664  ;;  %1164 = vpow2.f32 %v931_v30 }
 0x79c   :  { %v661_v11 = vpop.permute.xlu1 %660  ;;  %v667_v16 = vmul.f32 %v1155_v29, %v665_v7  ;;  %v832_v29 = vrot.slane %v1351_v9, %v818_v53  ;;  %v858_v7 = vcombine.high %v856_v5, %v856_v5 }
 0x79d   :  { %v663_v18 = vmul.f32 %v661_v11, %v658_v8  ;;  %v857_v8 = vcombine.high %v849_v6, %v849_v6 }
 0x79e   :  { %v840_v56 = vcombine.high %v832_v29, %v832_v29  ;;  %v877_v11 = vcombine.low %v856_v5, %v858_v7 }
 0x79f   :  { %v668_v41 = vadd.f32 %v667_v16, %v663_v18  ;;  %v876_v12 = vcombine.low %v849_v6, %v857_v8 }
 0x7a0   :  { %v859_v57 = vcombine.low %v832_v29, %v840_v56  ;;  %v891_v14 = vrot.slane %v877_v11, %v818_v53 }
 0x7a1   :  { %706 = vrot.lane.b32.xlu0 %v668_v41, %s1234_s22  ;;  %v819_v60 = vrot.slane %v668_v41, %v818_v53  ;;  %v884_v15 = vrot.slane %v876_v12, %v818_v53 }
 0x7a2   :  { %v867_v58 = vrot.slane %v859_v57, %v818_v53 }
 0x7a3   :  { %v892_v16 = vcombine.low %v884_v15, %v891_v14 }
 0x7a4   :  { %v1163_v23 = vpop.eup %1162  ;;  %v875_v59 = vcombine.low %v867_v58, %v874_v35 }
 0x7a5   :  { %699 = vrot.lane.b32.xlu1 %v1163_v23, %s1234_s22  ;;  %v1165_v31 = vpop.eup %1164 }
 0x7a6   :  { %v684_v33 = vadd.f32 1.0, %v1165_v31 }
 0x7a8   :  { %1166 = vrcp.f32 %v684_v33 }
 0x7b2   :  { %v1167_v34 = vpop.eup %1166 }
 0x7b3   :  { %v697_v37 = vsub.f32 1.0, %v1167_v34  ;;  %v703_v39 = vmul.f32 %v1167_v34, %v1300_v13 }
 0x813   :  { %v707_v36 = vpop.permute.xlu0 %706 }
 0x814   :  { %710 = vst.msk [vmem:[#allocation2] sm:$0x3] %vm51_vm1, %v707_v36 }
 0x817   :  { %v700_v38 = vpop.permute.xlu1 %699 }
 0x818   :  { %v702_v40 = vmul.f32 %v700_v38, %v697_v37 }
 0x81a   :  { %v704_v43 = vadd.f32 %v703_v39, %v702_v40 }
 0x81c   :  { %711 = vst.msk [vmem:[#allocation2 + $0x2] sm:$0x3] %vm51_vm1, %v704_v43  ;;  %824 = vst.msk [vmem:[%s1441_s4 + $0x4] sm:$0x3] %vm51_vm1, %v704_v43  ;;  %713 = vrot.lane.b32.xlu1 %v704_v43, %s1229_s19 }
 0x88e   :  { %v714_v0 = vpop.permute.xlu1 %713 }
 0x88f   :  { %v716_v44 = vsel %vm61_vm2, %v707_v36, %v714_v0 }
 0x890   :  { %1062 = vmatmul.mubr.msk.f32.vlgmr.msra.gmra.mrb[4].mxu0 %vm73_vm3, %v716_v44 }
 0x963   :  { %v795_v13 = vpop.f32.mrb[4].mxu0 }
 0x964   :  { %v796_v48 = vadd.f32 %v795_v13, %v725_v47  ;;  %v1063_v49 = vpop.f32.mrb[5].mxu0 }
 0x966   :  { %v800_v52 = vsel %vm799_vm9, %v796_v48, -inf }
 0x967   :  { %801 = vmax.xlane.f32.xlu0 %v800_v52 }
 0x97d   :  { %894 = vperm.xlu0 %1143, %v875_v59  }
 0x981   :  { %820 = vrot.lane.b32.xlu0 %v819_v60, %s1234_s22 }
 0x9f4   :  { %v802_v61 = vpop.xlane.xlu0 %801 }
 0x9f5   :  { %v803_v62 = vsub.f32 %v796_v48, %v802_v61 }
 0x9f7   :  { %v804_v63 = vmul.f32 1.442695, %v803_v62 }
 0x9f9   :  { %1168 = vpow2.f32 %v804_v63 }
 0x9fc   :  { %v895_v2 = vpop.permute.xlu0 %894 }
 0x9fd   :  { %v902_v20 = vrot.slane %v895_v2, %v1334_v42 }
 0xa00   :  { %v821_v9 = vpop.permute.xlu0 %820 }
 0xa01   :  { %823 = vst.msk [vmem:[%s1441_s4 + $0x2] sm:$0x3] %vm51_vm1, %v821_v9 }
 0xa03   :  { %v1169_v3 = vpop.eup %1168 }
 0xa04   :  { %v806_v4 = vsel %vm799_vm9, %v1169_v3, 0.0 }
 0xa05   :  { %807 = vadd.xlane.f32.xlu1 %v806_v4 }
 0xa16   :  { %897 = vperm.xlu1 %1142, %v892_v16  }
 0xa92   :  { %v808_v18 = vpop.xlane.xlu1 %807 }
 0xa93   :  { %1170 = vlog2.f32 %v808_v18 }
 0xa96   :  { %v898_v19 = vpop.permute.xlu1 %897 }
 0xa97   :  { %v906_v41 = vrot.slane %v898_v19, %v1334_v42 }
 0xa99   :  { %v907_v17 = vsel %vm200_vm4, %v906_v41, %v902_v20 }
 0xa9a   :  { %v914_v50 = vrot.slane %v907_v17, %v818_v53 }
 0xa9c   :  { %916 = vst.msk [vmem:[%s1441_s4 + $0x6] sm:$0x3] %vm203_vm5, %v914_v50 }
 0xa9d   :  { %v1171_v10 = vpop.eup %1170 }
 0xa9e   :  { %v810_v21 = vmul.f32 0.6931472, %v1171_v10 }
 0xaa0   :  { %v811_v22 = vsub.f32 %v803_v62, %v810_v21 }
 0xaa2   :  { %812 = vst.msk [vmem:[%s1441_s4] sm:$0x3] %vm799_vm9, %v811_v22 }
 0xaa3   :  { %921 = vsyncpa [#allocation4], 1 }
 0xaa4   :  { %922 = vsyncpa [#allocation6], 1 }

</bundles_post_ra>
